<compile_context>
chip_gen: v5e
topology: v5e:2x2
jax: 0.10.0
libtpu: 0.0.40
codegen_flags: <defaults>
</compile_context>

<pallas_src>
import functools

import jax
import jax.numpy as jnp
from jax.experimental import pallas as pl
from jax.experimental.pallas import tpu as pltpu

EPS = 1e-5                      # torch BatchNorm1d default
LANE = 128                      # TPU lane width (feature dims padded to this)
SUBLANE = 8
VMEM_LIMIT = 32 * 1024 * 1024   # fits default scoped VMEM on v5e/v6e/v7x


def _round_up(x, m):
    return ((x + m - 1) // m) * m


def _pad2(a, rows, cols):
    return jnp.pad(a, ((0, rows - a.shape[0]), (0, cols - a.shape[1])))


def _bn_eval(x, gamma, beta, rmean, rvar):
    return (x - rmean) * gamma * jax.lax.rsqrt(rvar + EPS) + beta


def _full_block_spec(shape):
    """Whole-array block (index_map absorbs grid indices + scalar-prefetch refs)."""
    nd = len(shape)
    return pl.BlockSpec(shape, lambda *args: (0,) * nd)


# ---------------------------------------------------------------------------
# Kernel 1: input projection  y = x @ W + b   (row-tiled, parallel grid)
# ---------------------------------------------------------------------------
def _input_proj_kernel(x_ref, w_ref, b_ref, o_ref):
    o_ref[...] = (
        jnp.dot(x_ref[...], w_ref[...], preferred_element_type=jnp.float32)
        + b_ref[...]
    )


def input_proj(x_pad, w_pad, b_pad, row_tile):
    n_rows, d_in = x_pad.shape
    h = w_pad.shape[1]
    return pl.pallas_call(
        _input_proj_kernel,
        out_shape=jax.ShapeDtypeStruct((n_rows, h), jnp.float32),
        grid_spec=pltpu.PrefetchScalarGridSpec(
            num_scalar_prefetch=0,
            grid=(n_rows // row_tile,),
            in_specs=[
                pl.BlockSpec((row_tile, d_in), lambda i: (i, 0)),
                pl.BlockSpec((d_in, h), lambda i: (0, 0)),   # weights stay resident
                pl.BlockSpec((1, h), lambda i: (0, 0)),
            ],
            out_specs=pl.BlockSpec((row_tile, h), lambda i: (i, 0)),
        ),
        compiler_params=pltpu.CompilerParams(
            dimension_semantics=("parallel",),
            vmem_limit_bytes=VMEM_LIMIT),
    )(x_pad, w_pad, b_pad)


# ---------------------------------------------------------------------------
# Kernel 2: ALL MPNN layers fused; h resident in VMEM across layers.
#   per layer: in-kernel gather h[dst]/h[src] -> message MLP (BN folded, split
#   matmul so the concat is never materialized) -> in-kernel scatter-add to dst
#   -> node MLP -> ReLU -> residual.
# ---------------------------------------------------------------------------
def _fused_layers_kernel(src_ref, dst_ref,                 # scalar-prefetched (SMEM)
                         h0_ref, es_ref,
                         w1d_ref, w1s_ref, w1e_ref, b1_ref,
                         w2_ref, b2_ref, wn_ref, bn_ref,
                         h_ref,                            # output; also the live h buffer
                         hd_scr, hs_scr, m_scr, acc_scr):
    n_edges = hd_scr.shape[0]
    num_layers = w2_ref.shape[0]

    h_ref[...] = h0_ref[...]

    for l in range(num_layers):        # static unroll over layers; h never leaves VMEM
        # --- gather h[dst] (x_i) and h[src] (x_j) per edge ---
        def gather(e, carry):
            d = dst_ref[e]
            s = src_ref[e]
            hd_scr[pl.ds(e, 1), :] = h_ref[pl.ds(d, 1), :]
            hs_scr[pl.ds(e, 1), :] = h_ref[pl.ds(s, 1), :]
            return carry
        jax.lax.fori_loop(0, n_edges, gather, 0)

        # --- message MLP: Linear(+folded BN) -> ReLU -> Linear ---
        m = (jnp.dot(hd_scr[...], w1d_ref[l], preferred_element_type=jnp.float32)
             + jnp.dot(hs_scr[...], w1s_ref[l], preferred_element_type=jnp.float32)
             + jnp.dot(es_ref[...], w1e_ref[l], preferred_element_type=jnp.float32)
             + b1_ref[l])
        m = jnp.maximum(m, 0.0)        # ReLU; Dropout = identity (eval)
        m_scr[...] = (jnp.dot(m, w2_ref[l], preferred_element_type=jnp.float32)
                      + b2_ref[l])

        # --- aggr='add': exact scatter-add of messages to destination nodes ---
        acc_scr[...] = jnp.zeros_like(acc_scr)

        def scatter(e, carry):
            d = dst_ref[e]
            acc_scr[pl.ds(d, 1), :] = acc_scr[pl.ds(d, 1), :] + m_scr[pl.ds(e, 1), :]
            return carry
        jax.lax.fori_loop(0, n_edges, scatter, 0)

        # --- update + residual: h = h + ReLU(node_mlp(h) + aggr) ---
        upd = (jnp.dot(h_ref[...], wn_ref[l], preferred_element_type=jnp.float32)
               + bn_ref[l] + acc_scr[...])
        h_ref[...] = h_ref[...] + jnp.maximum(upd, 0.0)


def fused_mpnn_layers(src, dst, h0, edge_static, stacks):
    n_rows, hp = h0.shape
    n_edges = edge_static.shape[0]
    ins = (h0, edge_static, stacks["w1d"], stacks["w1s"], stacks["w1e"],
           stacks["b1"], stacks["w2"], stacks["b2"], stacks["wn"], stacks["bn"])
    return pl.pallas_call(
        _fused_layers_kernel,
        out_shape=jax.ShapeDtypeStruct((n_rows, hp), jnp.float32),
        grid_spec=pltpu.PrefetchScalarGridSpec(
            num_scalar_prefetch=2,                 # src, dst indices -> SMEM
            grid=(1,),
            in_specs=[_full_block_spec(a.shape) for a in ins],
            out_specs=_full_block_spec((n_rows, hp)),
            scratch_shapes=[
                pltpu.VMEM((n_edges, hp), jnp.float32),   # h[dst] gather
                pltpu.VMEM((n_edges, hp), jnp.float32),   # h[src] gather
                pltpu.VMEM((n_edges, hp), jnp.float32),   # messages
                pltpu.VMEM((n_rows, hp), jnp.float32),    # scatter accumulator
            ]),
        compiler_params=pltpu.CompilerParams(
            dimension_semantics=("arbitrary",),
            vmem_limit_bytes=VMEM_LIMIT),
    )(src, dst, *ins)


# ---------------------------------------------------------------------------
# Kernel 3: global mean pool (in-kernel segment mean over batch index) + output
#           MLP (Linear(+folded BN) -> ReLU -> Linear), lane-dense output.
# ---------------------------------------------------------------------------
def _pool_output_kernel(batch_ref, h_ref, invc_ref,
                        w1_ref, b1_ref, w2_ref, b2_ref,
                        o_ref, acc_scr, *, n_nodes):
    acc_scr[...] = jnp.zeros_like(acc_scr)

    def body(n, carry):
        g = batch_ref[n]
        acc_scr[pl.ds(g, 1), :] = acc_scr[pl.ds(g, 1), :] + h_ref[pl.ds(n, 1), :]
        return carry
    jax.lax.fori_loop(0, n_nodes, body, 0)

    pooled = acc_scr[...] * invc_ref[...]
    y = jnp.maximum(
        jnp.dot(pooled, w1_ref[...], preferred_element_type=jnp.float32) + b1_ref[...],
        0.0)                                                 # ReLU; Dropout = identity
    o_ref[...] = (jnp.dot(y, w2_ref[...], preferred_element_type=jnp.float32)
                  + b2_ref[...])


def pool_output(batch_idx, h, inv_counts, out_p, n_nodes):
    b = inv_counts.shape[0]
    hp = h.shape[1]
    op = out_p["w2"].shape[1]
    ins = (h, inv_counts, out_p["w1"], out_p["b1"], out_p["w2"], out_p["b2"])
    kernel = functools.partial(_pool_output_kernel, n_nodes=n_nodes)
    return pl.pallas_call(
        kernel,
        out_shape=jax.ShapeDtypeStruct((b, op), jnp.float32),
        grid_spec=pltpu.PrefetchScalarGridSpec(
            num_scalar_prefetch=1,                 # batch index -> SMEM
            grid=(1,),
            in_specs=[_full_block_spec(a.shape) for a in ins],
            out_specs=_full_block_spec((b, op)),
            scratch_shapes=[pltpu.VMEM((b, hp), jnp.float32)]),
        compiler_params=pltpu.CompilerParams(
            dimension_semantics=("arbitrary",),
            vmem_limit_bytes=VMEM_LIMIT),
    )(batch_idx, *ins)


# ---------------------------------------------------------------------------
# Parameter preparation: fold eval BatchNorm into the preceding Linear, split
# the message-MLP first Linear (x_i | x_j | edge static), pad lanes to 128.
# ---------------------------------------------------------------------------
def prepare_params(params, input_dim, edge_dim, hidden_dim, output_dim):
    h = hidden_dim
    hp = _round_up(hidden_dim, LANE)
    dip = _round_up(input_dim, LANE)
    esp = _round_up(edge_dim + 3, LANE)
    op = _round_up(output_dim, LANE)

    def fold_bn(w, b, g, be, rm, rv):
        s = g * jax.lax.rsqrt(rv + EPS)          # [1, dim]
        return w * s, (b - rm) * s + be

    prep = {
        "in_w": _pad2(params["in_w"], dip, hp),
        "in_b": _pad2(params["in_b"], 1, hp),
    }

    stacks = {k: [] for k in ("w1d", "w1s", "w1e", "b1", "w2", "b2", "wn", "bn")}
    for p in params["layers"]:
        w1f, b1f = fold_bn(p["w1"], p["b1"], p["g1"], p["be1"], p["rm1"], p["rv1"])
        stacks["w1d"].append(_pad2(w1f[:h], hp, hp))          # x_i  = h[dst]
        stacks["w1s"].append(_pad2(w1f[h:2 * h], hp, hp))     # x_j  = h[src]
        stacks["w1e"].append(_pad2(w1f[2 * h:], esp, hp))     # edge_attr ++ rel_pos
        stacks["b1"].append(_pad2(b1f, 1, hp))
        stacks["w2"].append(_pad2(p["w2"], hp, hp))
        stacks["b2"].append(_pad2(p["b2"], 1, hp))
        stacks["wn"].append(_pad2(p["wn"], hp, hp))
        stacks["bn"].append(_pad2(p["bn"], 1, hp))
    prep["layers"] = {k: jnp.stack(v) for k, v in stacks.items()}

    po = params["out"]
    ow1f, ob1f = fold_bn(po["w1"], po["b1"], po["g"], po["be"], po["rm"], po["rv"])
    prep["out"] = {
        "w1": _pad2(ow1f, hp, hp),
        "b1": _pad2(ob1f, 1, hp),
        "w2": _pad2(po["w2"], hp, op),
        "b2": _pad2(po["b2"], 1, op),
    }
    return prep


# ---------------------------------------------------------------------------
# Full MPNN forward (glue in plain JAX: self-loops, static edge features, counts)
# ---------------------------------------------------------------------------
def mpnn_forward(params, x, edge_index, edge_attr, pos, batch, num_graphs,
                 hidden_dim, output_dim):
    n_nodes, input_dim = x.shape
    edge_dim = edge_attr.shape[1]
    prep = prepare_params(params, input_dim, edge_dim, hidden_dim, output_dim)

    dip = prep["in_w"].shape[0]
    esp = prep["layers"]["w1e"].shape[2]

    # input projection: row-tiled, parallel grid
    row_tile = min(256, _round_up(n_nodes, SUBLANE))
    n_rows = _round_up(n_nodes, row_tile)
    x_pad = _pad2(x, n_rows, dip)
    h0 = input_proj(x_pad, prep["in_w"], prep["in_b"], row_tile)

    # add_self_loops: append (i, i) for every node, with zero edge_attr
    loops = jnp.arange(n_nodes, dtype=edge_index.dtype)
    ei = jnp.concatenate([edge_index, jnp.stack([loops, loops])], axis=1)
    ea = jnp.concatenate(
        [edge_attr, jnp.zeros((n_nodes, edge_dim), edge_attr.dtype)], axis=0)
    src = ei[0].astype(jnp.int32)
    dst = ei[1].astype(jnp.int32)            # PyG: x_j = x[src], x_i = x[dst]
    rel_pos = pos[dst] - pos[src]            # pos_i - pos_j
    edge_static = _pad2(jnp.concatenate([ea, rel_pos], axis=1), ea.shape[0], esp)

    # all MPNN layers fused, h resident in VMEM, exact in-kernel scatter-add
    h = fused_mpnn_layers(src, dst, h0, edge_static, prep["layers"])

    # global_mean_pool + output MLP
    counts = jax.ops.segment_sum(jnp.ones((n_nodes,), jnp.float32), batch,
                                 num_segments=num_graphs)
    inv_counts = (1.0 / jnp.maximum(counts, 1.0))[:, None]
    out = pool_output(batch.astype(jnp.int32), h, inv_counts, prep["out"], n_nodes)
    return out[:, :output_dim]


# ---------------------------------------------------------------------------
# Deterministic parameter init (synthetic; not a checkpoint load)
# ---------------------------------------------------------------------------
def init_params(key, input_dim, edge_dim, hidden_dim, output_dim, num_layers):
    def nxt():
        nonlocal key
        key, sub = jax.random.split(key)
        return sub

    def lin(din, dout):
        w = jax.random.normal(nxt(), (din, dout), jnp.float32) * 0.1
        b = jax.random.normal(nxt(), (1, dout), jnp.float32) * 0.05
        return w, b

    def bn(dim):
        g = 1.0 + 0.1 * jax.random.normal(nxt(), (1, dim), jnp.float32)
        be = 0.05 * jax.random.normal(nxt(), (1, dim), jnp.float32)
        rm = jnp.zeros((1, dim), jnp.float32)   # fresh running stats
        rv = jnp.ones((1, dim), jnp.float32)
        return g, be, rm, rv

    in_w, in_b = lin(input_dim, hidden_dim)
    layers = []
    msg_dim = 2 * hidden_dim + edge_dim + 3
    for _ in range(num_layers):
        w1, b1 = lin(msg_dim, hidden_dim)
        g1, be1, rm1, rv1 = bn(hidden_dim)
        w2, b2 = lin(hidden_dim, hidden_dim)
        wn, bnb = lin(hidden_dim, hidden_dim)
        layers.append(dict(w1=w1, b1=b1, g1=g1, be1=be1, rm1=rm1, rv1=rv1,
                           w2=w2, b2=b2, wn=wn, bn=bnb))
    ow1, ob1 = lin(hidden_dim, hidden_dim)
    og, obe, orm, orv = bn(hidden_dim)
    ow2, ob2 = lin(hidden_dim, output_dim)
    out = dict(w1=ow1, b1=ob1, g=og, be=obe, rm=orm, rv=orv, w2=ow2, b2=ob2)
    return dict(in_w=in_w, in_b=in_b, layers=layers, out=out)


# ---------------------------------------------------------------------------
# Pure-JAX reference (faithful to the original un-folded math)
# ---------------------------------------------------------------------------
def mpnn_reference(params, x, edge_index, edge_attr, pos, batch, num_graphs):
    n = x.shape[0]
    h = x @ params["in_w"] + params["in_b"]
    loops = jnp.arange(n, dtype=edge_index.dtype)
    ei = jnp.concatenate([edge_index, jnp.stack([loops, loops])], axis=1)
    ea = jnp.concatenate(
        [edge_attr, jnp.zeros((n, edge_attr.shape[1]), edge_attr.dtype)], axis=0)
    src, dst = ei[0], ei[1]
    rel_pos = pos[dst] - pos[src]
    for p in params["layers"]:
        msg_in = jnp.concatenate([h[dst], h[src], ea, rel_pos], axis=1)
        m = msg_in @ p["w1"] + p["b1"]
        m = _bn_eval(m, p["g1"], p["be1"], p["rm1"], p["rv1"])
        m = jnp.maximum(m, 0.0)
        m = m @ p["w2"] + p["b2"]
        aggr = jax.ops.segment_sum(m, dst, num_segments=n)
        upd = jnp.maximum(h @ p["wn"] + p["bn"] + aggr, 0.0)
        h = h + upd
    oh = jax.nn.one_hot(batch, num_graphs, dtype=jnp.float32).T
    pooled = (oh @ h) / jnp.maximum(oh.sum(axis=1, keepdims=True), 1.0)
    po = params["out"]
    y = jnp.maximum(_bn_eval(pooled @ po["w1"] + po["b1"],
                             po["g"], po["be"], po["rm"], po["rv"]), 0.0)
    return y @ po["w2"] + po["b2"]


if __name__ == "__main__":
    INPUT_DIM, EDGE_DIM, HIDDEN_DIM, OUTPUT_DIM, NUM_LAYERS = 32, 8, 16, 16, 2
    N_NODES, N_EDGES, N_GRAPHS = 8, 12, 2

    key = jax.random.PRNGKey(0)
    kx, ke, kp, kei, kparam = jax.random.split(key, 5)

    x = jax.random.normal(kx, (N_NODES, INPUT_DIM), jnp.float32)
    edge_attr = jax.random.normal(ke, (N_EDGES, EDGE_DIM), jnp.float32)
    pos = jax.random.normal(kp, (N_NODES, 3), jnp.float32)
    edge_index = jax.random.randint(kei, (2, N_EDGES), 0, N_NODES, jnp.int32)
    batch = jnp.array([0, 0, 0, 0, 1, 1, 1, 1], jnp.int32)

    params = init_params(kparam, INPUT_DIM, EDGE_DIM, HIDDEN_DIM, OUTPUT_DIM,
                         NUM_LAYERS)

    out = mpnn_forward(params, x, edge_index, edge_attr, pos, batch, N_GRAPHS,
                       HIDDEN_DIM, OUTPUT_DIM)
    out = jax.block_until_ready(out)

    ref = mpnn_reference(params, x, edge_index, edge_attr, pos, batch, N_GRAPHS)
    assert out.shape == (N_GRAPHS, OUTPUT_DIM)
    err = jnp.max(jnp.abs(out - ref))
    assert jnp.allclose(out, ref, atol=2e-3, rtol=2e-3), (
        f"mismatch: max abs err {err}")

    print("KERNEL_OK")
</pallas_src>

<mosaic_0001>
module attributes {stable_mosaic.version = 11 : i64} {
  func.func @_input_proj_kernel(%arg0: i32, %arg1: memref<8x128xf32, #tpu.memory_space<vmem>>, %arg2: memref<128x128xf32, #tpu.memory_space<vmem>>, %arg3: memref<1x128xf32, #tpu.memory_space<vmem>>, %arg4: memref<8x128xf32, #tpu.memory_space<vmem>>) attributes {dimension_semantics = [#tpu.dimension_semantics<parallel>], iteration_bounds = array<i64: 1>, scalar_prefetch = 0 : i64, scratch_operands = 0 : i64, tpu.core_type = #tpu.core_type<tc>, window_params = [{transform_indices = @transform_0, window_bounds = array<i64: 8, 128>}, {pipeline_mode = #tpu.pipeline_mode<synchronous>, transform_indices = @transform_1, window_bounds = array<i64: 128, 128>}, {pipeline_mode = #tpu.pipeline_mode<synchronous>, transform_indices = @transform_2, window_bounds = array<i64: 1, 128>}, {transform_indices = @transform_3, window_bounds = array<i64: 8, 128>}]} {
    %c0 = arith.constant 0 : index
    %c0_0 = arith.constant 0 : index
    %0 = vector.load %arg1[%c0, %c0_0] : memref<8x128xf32, #tpu.memory_space<vmem>>, vector<8x128xf32>
    %c0_1 = arith.constant 0 : index
    %c0_2 = arith.constant 0 : index
    %1 = vector.load %arg2[%c0_1, %c0_2] : memref<128x128xf32, #tpu.memory_space<vmem>>, vector<128x128xf32>
    %cst = arith.constant dense<0.000000e+00> : vector<8x128xf32>
    %2 = tpu.matmul %0, %1, %cst {dimension_numbers = #tpu.dot_dimension_numbers<[1], [0], [0], [1], [0, 0, 1, 1], [], []>} : vector<8x128xf32>, vector<128x128xf32>, vector<8x128xf32> -> vector<8x128xf32>
    %c0_3 = arith.constant 0 : index
    %c0_4 = arith.constant 0 : index
    %3 = vector.load %arg3[%c0_3, %c0_4] : memref<1x128xf32, #tpu.memory_space<vmem>>, vector<1x128xf32>
    %4 = vector.broadcast %3 : vector<1x128xf32> to vector<8x128xf32>
    %5 = arith.addf %2, %4 : vector<8x128xf32>
    %c0_5 = arith.constant 0 : index
    %c0_6 = arith.constant 0 : index
    %6 = vector.load %arg4[%c0_5, %c0_6] : memref<8x128xf32, #tpu.memory_space<vmem>>, vector<8x128xf32>
    tpu.vector_store %arg4[%c0_5, %c0_6], %5 {strides = array<i32>} : memref<8x128xf32, #tpu.memory_space<vmem>>, vector<8x128xf32>,
    return
  }
  func.func @transform_0(%arg0: i32) -> (i32, i32) {
    %c0_i32 = arith.constant 0 : i32
    %c0_i32_0 = arith.constant 0 : i32
    return %arg0, %c0_i32 : i32, i32
  }
  func.func @transform_1(%arg0: i32) -> (i32, i32) {
    %c0_i32 = arith.constant 0 : i32
    %c0_i32_0 = arith.constant 0 : i32
    %c0_i32_1 = arith.constant 0 : i32
    return %c0_i32, %c0_i32_0 : i32, i32
  }
  func.func @transform_2(%arg0: i32) -> (i32, i32) {
    %c0_i32 = arith.constant 0 : i32
    %c0_i32_0 = arith.constant 0 : i32
    %c0_i32_1 = arith.constant 0 : i32
    return %c0_i32, %c0_i32_0 : i32, i32
  }
  func.func @transform_3(%arg0: i32) -> (i32, i32) {
    %c0_i32 = arith.constant 0 : i32
    %c0_i32_0 = arith.constant 0 : i32
    return %arg0, %c0_i32 : i32, i32
  }
}

</mosaic_0001>

<bundles_post_ra>
// kernel: tpu_custom_call.1
= control target key start
LH: loop header
LB: loop body
LE: loop exit
PB: predicated region body
PF: predicated region fallthrough
CT: control target
= control target key end

     0   :  { %8 = vsyncpa [#allocation3], 0  ;;  %s226_s0 = inlined_call_operand.hbm [shape: f32[8,128], index: 0, kind: input, shape index: {}]   ;;  %s227_s1 = inlined_call_operand.hbm [shape: f32[128,128], index: 1, kind: input, shape index: {}]   ;;  %s228_s2 = inlined_call_operand.vmem [shape: f32[1,128], index: 2, kind: input, shape index: {}]   ;;  %s229_s3 = inlined_call_operand.hbm [shape: f32[8,128], index: 3, kind: output, shape index: {}]  }
   0x1   :  { %9 = vsyncpa [#allocation6], 0 }
   0x2   :  { %10 = vsyncpa [#allocation4], 0  ;;  %s16_s14 = sshll.u32 %s226_s0, 4  ;;  %s189_s15 = smov [#allocation2]   ;;  %s17_s14 = int_to_ptr.hbm [resolvable:$true] %s16_s14 }
   0x3   :  { %s18_s16 = sshll.u32 %s189_s15, 4  ;;  %s26_s19 = sshll.u32 %s227_s1, 4  ;;  %s19_s16 = int_to_ptr.vmem [resolvable:$true] %s18_s16  ;;  %s27_s19 = int_to_ptr.hbm [resolvable:$true] %s26_s19 }
   0x4   :  { %21 = dma.hbm_to_vmem [thread:$0]  %s17_s14, 128, %s19_s16, [#allocation3]  }
   0x5   :  { %s190_s20 = smov [#allocation5]   ;;  %s191_s22 = smov 128  }
   0x6   :  { %s28_s21 = sshll.u32 %s190_s20, 4  ;;  %s192_s23 = smov 8   ;;  %s29_s21 = int_to_ptr.vmem [resolvable:$true] %s28_s21 }
   0x7   :  { %34 = dma.hbm_to_vmem [thread:$0]  %s27_s19, 2048, %s29_s21, [#allocation6], %s191_s22, %s191_s22, %s192_s23  }
   0x8   :  { %183 = dma.done.wait [#allocation3], 128  }
   0x9   :  { %184 = vsyncadd [#allocation3], 4294967168 }
   0xa   :  { %185 = dma.done.wait [#allocation6], 2048  }
   0xb   :  { %186 = vsyncadd [#allocation6], 4294965248  ;;  %v61_v0 = vld [vmem:[#allocation5 + $0x78] sm:$0xff]  ;;  %v60_v1 = vld [vmem:[#allocation5 + $0x70] sm:$0xff]  ;;  %s193_s24 = smov [#allocation7]   ;;  %s94_s28 = sshll.u32 %s229_s3, 4  ;;  %s95_s28 = int_to_ptr.hbm [resolvable:$true] %s94_s28 }
   0xc   :  { %66 = vmatpush.msra.mxu0 %v61_v0  ;;  %v59_v2 = vld [vmem:[#allocation5 + $0x68] sm:$0xff]  ;;  %v58_v3 = vld [vmem:[#allocation5 + $0x60] sm:$0xff]  ;;  %v57_v4 = vld [vmem:[#allocation5 + $0x58] sm:$0xff]  ;;  %s92_s25 = sshll.u32 %s193_s24, 4  ;;  %s93_s25 = int_to_ptr.vmem [resolvable:$true] %s92_s25 }
   0xd   :  { %v56_v5 = vld [vmem:[#allocation5 + $0x50] sm:$0xff]  ;;  %v55_v6 = vld [vmem:[#allocation5 + $0x48] sm:$0xff]  ;;  %v54_v7 = vld [vmem:[#allocation5 + $0x40] sm:$0xff] }
   0xe   :  { %67 = vmatpush.msra.mxu0 %v60_v1  ;;  %v53_v8 = vld [vmem:[#allocation5 + $0x38] sm:$0xff]  ;;  %v52_v9 = vld [vmem:[#allocation5 + $0x30] sm:$0xff]  ;;  %v51_v10 = vld [vmem:[#allocation5 + $0x28] sm:$0xff] }
   0xf   :  { %v50_v11 = vld [vmem:[#allocation5 + $0x20] sm:$0xff]  ;;  %v49_v12 = vld [vmem:[#allocation5 + $0x18] sm:$0xff]  ;;  %v48_v13 = vld [vmem:[#allocation5 + $0x10] sm:$0xff] }
  0x10   :  { %68 = vmatpush.msra.mxu0 %v59_v2  ;;  %v47_v14 = vld [vmem:[#allocation5 + $0x8] sm:$0xff]  ;;  %v46_v15 = vld [vmem:[#allocation5] sm:$0xff]  ;;  %v45_v16 = vld [vmem:[#allocation2] sm:$0xff] }
  0x11   :  { %v110_v17 = vld [vmem:[%s228_s2] ss:$0 sm:$0xff] }
  0x12   :  { %69 = vmatpush.msra.mxu0 %v58_v3 }
  0x14   :  { %70 = vmatpush.msra.mxu0 %v57_v4 }
  0x16   :  { %71 = vmatpush.msra.mxu0 %v56_v5 }
  0x18   :  { %72 = vmatpush.msra.mxu0 %v55_v6 }
  0x1a   :  { %73 = vmatpush.msra.mxu0 %v54_v7 }
  0x1c   :  { %74 = vmatpush.msra.mxu0 %v53_v8 }
  0x1e   :  { %75 = vmatpush.msra.mxu0 %v52_v9 }
  0x20   :  { %76 = vmatpush.msra.mxu0 %v51_v10 }
  0x22   :  { %77 = vmatpush.msra.mxu0 %v50_v11 }
  0x24   :  { %78 = vmatpush.msra.mxu0 %v49_v12 }
  0x26   :  { %79 = vmatpush.msra.mxu0 %v48_v13 }
  0x28   :  { %80 = vmatpush.msra.mxu0 %v47_v14 }
  0x2a   :  { %81 = vmatpush.msra.mxu0 %v46_v15 }
  0x2b   :  { %82 = vmatmul.f32.vlgmr.msra.gmra.mxu0 %v45_v16 }
  0xa8   :  { %v83_v18 = vpop.f32.mrf.mxu0 }
  0xa9   :  { %v84_v19 = vadd.f32 %v110_v17, %v83_v18 }
  0xab   :  { %86 = vst [vmem:[#allocation7] sm:$0xff] %v84_v19 }
  0xac   :  { %97 = dma.vmem_to_hbm [thread:$0]  %s93_s25, 128, %s95_s28, [#allocation4]  }
  0xad   :  { %187 = dma.done.wait [#allocation4], 128  }
  0xae   :  { %188 = vsyncadd [#allocation4], 4294967168 }
  0xaf   :  { %102 = vsyncpa [#allocation3], 1 }
  0xb0   :  { %103 = vsyncpa [#allocation6], 1 }
  0xb1   :  { %104 = vsyncpa [#allocation4], 1 }

</bundles_post_ra>
